<compile_context>
chip_gen: v5e
topology: v5e:2x2
jax: 0.10.0
libtpu: 0.0.40
codegen_flags: <defaults>
</compile_context>

<pallas_src>
import functools

import jax
import jax.numpy as jnp
from jax.experimental import pallas as pl
from jax.experimental.pallas import tpu as pltpu


def _mha_fused_kernel(q_ref, k_ref, v_ref, mask_ref, w_ref, b_ref, o_ref,
                      *, heads, scale):
    # Block shapes: q/o (1, TQ, E), k/v (1, Lk, E), mask (1, 1, TQ, Lk),
    # w (E, E), b (1, E).
    E = q_ref.shape[2]
    D = E // heads
    inv_scale = jnp.float32(1.0 / scale)

    # Fold the 1/sqrt(embed_size) scale into q (cheaper than scaling scores).
    q = q_ref[0].astype(jnp.float32) * inv_scale      # (TQ, E)
    k = k_ref[0]                                      # (Lk, E)
    v = v_ref[0]                                      # (Lk, E)
    keep = mask_ref[0, 0] != 0                        # (TQ, Lk)

    # Torch masks the *unscaled* energy with -1e20 and then divides by scale;
    # since the scale is folded into q, mask with -1e20/scale (same softmax).
    neg_big = jnp.float32(-1e20) * inv_scale

    head_outs = []
    for h in range(heads):                            # static → fully unrolled
        sl = slice(h * D, (h + 1) * D)
        qh = q[:, sl]                                 # (TQ, D)
        kh = k[:, sl]                                 # (Lk, D)
        vh = v[:, sl]                                 # (Lk, D)

        scores = jnp.dot(qh, kh.T, preferred_element_type=jnp.float32)
        scores = jnp.where(keep, scores, neg_big)

        # Softmax over the key axis (f32 throughout).
        mx = jnp.max(scores, axis=-1, keepdims=True)
        p = jnp.exp(scores - mx)
        l = jnp.sum(p, axis=-1, keepdims=True)
        # EUP reciprocal + one Newton step (~f32 accurate, frees VALU divide).
        r = pl.reciprocal(l, approx=True)
        r = r * (jnp.float32(2.0) - l * r)

        oh = jnp.dot(p, vh, preferred_element_type=jnp.float32) * r
        head_outs.append(oh)

    attn_out = jnp.concatenate(head_outs, axis=-1)    # (TQ, E) — lane-dense

    # Fused fc_out: attn_out @ W^T + b, contracting W on its 2nd axis
    # (no transposed weight copy needed in HBM or in the wrapper).
    proj = jax.lax.dot_general(
        attn_out, w_ref[...],
        dimension_numbers=(((1,), (1,)), ((), ())),
        preferred_element_type=jnp.float32,
    ) + b_ref[...]
    o_ref[0] = proj.astype(o_ref.dtype)


def multi_head_attention(values, keys, query, mask, fc_w, fc_b, *, heads,
                         q_tile=None):
    """values/keys/query: (N, L, E) f32; mask broadcastable to (N, 1, Lq, Lk)."""
    N, Lq, E = query.shape
    Lk = keys.shape[1]
    Lv = values.shape[1]
    D = E // heads
    assert D * heads == E, "embed_size must be divisible by heads"
    assert Lk == Lv
    scale = float(E) ** 0.5

    # Tile the query length so long sequences pipeline (and feed both v7x TCs).
    if q_tile is None:
        q_tile = Lq if Lq <= 256 else 256
    assert Lq % q_tile == 0
    nq = Lq // q_tile

    mask_i32 = jnp.broadcast_to(mask, (N, 1, Lq, Lk)).astype(jnp.int32)
    fc_b2 = fc_b.reshape(1, E)

    kernel = functools.partial(_mha_fused_kernel, heads=heads, scale=scale)

    out = pl.pallas_call(
        kernel,
        out_shape=jax.ShapeDtypeStruct((N, Lq, E), query.dtype),
        grid_spec=pltpu.PrefetchScalarGridSpec(
            num_scalar_prefetch=0,
            grid=(N, nq),
            in_specs=[
                pl.BlockSpec((1, q_tile, E), lambda n, qi: (n, qi, 0)),   # q
                pl.BlockSpec((1, Lk, E), lambda n, qi: (n, 0, 0)),        # k
                pl.BlockSpec((1, Lv, E), lambda n, qi: (n, 0, 0)),        # v
                pl.BlockSpec((1, 1, q_tile, Lk), lambda n, qi: (n, 0, qi, 0)),
                pl.BlockSpec((E, E), lambda n, qi: (0, 0)),               # fc_w (resident)
                pl.BlockSpec((1, E), lambda n, qi: (0, 0)),               # fc_b (resident)
            ],
            out_specs=pl.BlockSpec((1, q_tile, E), lambda n, qi: (n, qi, 0)),
        ),
        compiler_params=pltpu.CompilerParams(
            dimension_semantics=("parallel", "parallel")),
    )(query, keys, values, mask_i32, fc_w, fc_b2)

    return out


def _reference(values, keys, query, mask, fc_w, fc_b, heads):
    N, Lq, E = query.shape
    D = E // heads
    q = query.reshape(N, Lq, heads, D)
    k = keys.reshape(N, keys.shape[1], heads, D)
    v = values.reshape(N, values.shape[1], heads, D)
    energy = jnp.einsum('nqhd,nkhd->nhqk', q, k)
    energy = jnp.where(mask == 0, jnp.float32(-1e20), energy)
    attn = jax.nn.softmax(energy / (E ** 0.5), axis=3)
    out = jnp.einsum('nhql,nlhd->nqhd', attn, v).reshape(N, Lq, E)
    return out @ fc_w.T + fc_b


if __name__ == "__main__":
    N, L, E, H = 2, 8, 32, 4  # batch, seq, embed_size, heads

    key = jax.random.PRNGKey(0)
    kv, kk, kq, kw, kb = jax.random.split(key, 5)

    values = jax.random.normal(kv, (N, L, E), dtype=jnp.float32)
    keys = jax.random.normal(kk, (N, L, E), dtype=jnp.float32)
    query = jax.random.normal(kq, (N, L, E), dtype=jnp.float32)

    # Causal-style mask (1 = keep, 0 = mask), broadcastable to (N, H, Lq, Lk).
    mask = jnp.broadcast_to(
        jnp.tril(jnp.ones((L, L), dtype=jnp.int32))[None, None],
        (N, 1, L, L),
    )

    # fc_out parameters.  The module's values/keys/queries Linear layers are
    # never applied in forward(), so they are omitted.
    fc_w = 0.05 * jax.random.normal(kw, (E, E), dtype=jnp.float32)
    fc_b = 0.05 * jax.random.normal(kb, (E,), dtype=jnp.float32)

    out = multi_head_attention(values, keys, query, mask, fc_w, fc_b, heads=H)
    out = jax.block_until_ready(out)

    ref = _reference(values, keys, query, mask, fc_w, fc_b, H)
    assert out.shape == (N, L, E)
    assert jnp.allclose(out, ref, rtol=1e-4, atol=1e-4), "mismatch vs reference"

    print("KERNEL_OK")
</pallas_src>

<mosaic_0001>
module attributes {stable_mosaic.version = 11 : i64} {
  func.func @_mha_fused_kernel(%arg0: i32, %arg1: i32, %arg2: memref<1x8x32xf32, #tpu.memory_space<vmem>>, %arg3: memref<1x8x32xf32, #tpu.memory_space<vmem>>, %arg4: memref<1x8x32xf32, #tpu.memory_space<vmem>>, %arg5: memref<1x1x8x8xi32, #tpu.memory_space<vmem>>, %arg6: memref<32x32xf32, #tpu.memory_space<vmem>>, %arg7: memref<1x32xf32, #tpu.memory_space<vmem>>, %arg8: memref<1x8x32xf32, #tpu.memory_space<vmem>>) attributes {dimension_semantics = [#tpu.dimension_semantics<parallel>, #tpu.dimension_semantics<parallel>], iteration_bounds = array<i64: 2, 1>, scalar_prefetch = 0 : i64, scratch_operands = 0 : i64, tpu.core_type = #tpu.core_type<tc>, window_params = [{transform_indices = @transform_0, window_bounds = array<i64: 1, 8, 32>}, {transform_indices = @transform_1, window_bounds = array<i64: 1, 8, 32>}, {transform_indices = @transform_2, window_bounds = array<i64: 1, 8, 32>}, {transform_indices = @transform_3, window_bounds = array<i64: 1, 1, 8, 8>}, {pipeline_mode = #tpu.pipeline_mode<synchronous>, transform_indices = @transform_4, window_bounds = array<i64: 32, 32>}, {pipeline_mode = #tpu.pipeline_mode<synchronous>, transform_indices = @transform_5, window_bounds = array<i64: 1, 32>}, {transform_indices = @transform_6, window_bounds = array<i64: 1, 8, 32>}]} {
    %c0 = arith.constant 0 : index
    %c0_0 = arith.constant 0 : index
    %c0_1 = arith.constant 0 : index
    %0 = vector.load %arg2[%c0, %c0_0, %c0_1] : memref<1x8x32xf32, #tpu.memory_space<vmem>>, vector<1x8x32xf32>
    %1 = vector.shape_cast %0 : vector<1x8x32xf32> to vector<8x32xf32>
    %cst = arith.constant 0.176776692 : f32
    %2 = vector.broadcast %cst : f32 to vector<8x32xf32>
    %3 = arith.mulf %1, %2 : vector<8x32xf32>
    %c0_2 = arith.constant 0 : index
    %c0_3 = arith.constant 0 : index
    %c0_4 = arith.constant 0 : index
    %4 = vector.load %arg3[%c0_2, %c0_3, %c0_4] : memref<1x8x32xf32, #tpu.memory_space<vmem>>, vector<1x8x32xf32>
    %5 = vector.shape_cast %4 : vector<1x8x32xf32> to vector<8x32xf32>
    %c0_5 = arith.constant 0 : index
    %c0_6 = arith.constant 0 : index
    %c0_7 = arith.constant 0 : index
    %6 = vector.load %arg4[%c0_5, %c0_6, %c0_7] : memref<1x8x32xf32, #tpu.memory_space<vmem>>, vector<1x8x32xf32>
    %7 = vector.shape_cast %6 : vector<1x8x32xf32> to vector<8x32xf32>
    %c0_8 = arith.constant 0 : index
    %c0_9 = arith.constant 0 : index
    %c0_10 = arith.constant 0 : index
    %c0_11 = arith.constant 0 : index
    %8 = vector.load %arg5[%c0_8, %c0_9, %c0_10, %c0_11] : memref<1x1x8x8xi32, #tpu.memory_space<vmem>>, vector<1x1x8x8xi32>
    %9 = vector.shape_cast %8 : vector<1x1x8x8xi32> to vector<8x8xi32>
    %c0_i32 = arith.constant 0 : i32
    %10 = vector.broadcast %c0_i32 : i32 to vector<8x8xi32>
    %11 = arith.cmpi ne, %9, %10 : vector<8x8xi32>
    %cst_12 = arith.constant -1.000000e+20 : f32
    %cst_13 = arith.constant 0.176776692 : f32
    %12 = arith.mulf %cst_12, %cst_13 : f32
    %13 = vector.extract_strided_slice %3 {offsets = [0, 0], sizes = [8, 8], strides = [1, 1]} : vector<8x32xf32> to vector<8x8xf32>
    %14 = vector.extract_strided_slice %5 {offsets = [0, 0], sizes = [8, 8], strides = [1, 1]} : vector<8x32xf32> to vector<8x8xf32>
    %15 = vector.extract_strided_slice %7 {offsets = [0, 0], sizes = [8, 8], strides = [1, 1]} : vector<8x32xf32> to vector<8x8xf32>
    %16 = tpu.transpose %14, [1, 0] : vector<8x8xf32> -> vector<8x8xf32>
    %cst_14 = arith.constant dense<0.000000e+00> : vector<8x8xf32>
    %17 = tpu.matmul %13, %16, %cst_14 {dimension_numbers = #tpu.dot_dimension_numbers<[1], [0], [0], [1], [0, 0, 1, 1], [], []>} : vector<8x8xf32>, vector<8x8xf32>, vector<8x8xf32> -> vector<8x8xf32>
    %18 = vector.broadcast %12 : f32 to vector<8x8xf32>
    %19 = arith.select %11, %17, %18 : vector<8x8xi1>, vector<8x8xf32>
    %cst_15 = arith.constant dense<0xFF800000> : vector<8xf32>
    %20 = vector.multi_reduction <maximumf>, %19, %cst_15 [1] : vector<8x8xf32> to vector<8xf32>
    %21 = vector.shape_cast %20 : vector<8xf32> to vector<8x1xf32>
    %22 = vector.broadcast %21 : vector<8x1xf32> to vector<8x8xf32>
    %23 = arith.subf %19, %22 : vector<8x8xf32>
    %24 = math.exp %23 : vector<8x8xf32>
    %cst_16 = arith.constant dense<0.000000e+00> : vector<8xf32>
    %25 = vector.multi_reduction <add>, %24, %cst_16 [1] : vector<8x8xf32> to vector<8xf32>
    %26 = vector.shape_cast %25 : vector<8xf32> to vector<8x1xf32>
    %27 = tpu.reciprocal %26 {approx = true} : vector<8x1xf32> -> vector<8x1xf32>
    %28 = arith.mulf %26, %27 : vector<8x1xf32>
    %cst_17 = arith.constant 2.000000e+00 : f32
    %29 = vector.broadcast %cst_17 : f32 to vector<8x1xf32>
    %30 = arith.subf %29, %28 : vector<8x1xf32>
    %31 = arith.mulf %27, %30 : vector<8x1xf32>
    %cst_18 = arith.constant dense<0.000000e+00> : vector<8x8xf32>
    %32 = tpu.matmul %24, %15, %cst_18 {dimension_numbers = #tpu.dot_dimension_numbers<[1], [0], [0], [1], [0, 0, 1, 1], [], []>} : vector<8x8xf32>, vector<8x8xf32>, vector<8x8xf32> -> vector<8x8xf32>
    %33 = vector.broadcast %31 : vector<8x1xf32> to vector<8x8xf32>
    %34 = arith.mulf %32, %33 : vector<8x8xf32>
    %35 = vector.extract_strided_slice %3 {offsets = [0, 8], sizes = [8, 8], strides = [1, 1]} : vector<8x32xf32> to vector<8x8xf32>
    %36 = vector.extract_strided_slice %5 {offsets = [0, 8], sizes = [8, 8], strides = [1, 1]} : vector<8x32xf32> to vector<8x8xf32>
    %37 = vector.extract_strided_slice %7 {offsets = [0, 8], sizes = [8, 8], strides = [1, 1]} : vector<8x32xf32> to vector<8x8xf32>
    %38 = tpu.transpose %36, [1, 0] : vector<8x8xf32> -> vector<8x8xf32>
    %cst_19 = arith.constant dense<0.000000e+00> : vector<8x8xf32>
    %39 = tpu.matmul %35, %38, %cst_19 {dimension_numbers = #tpu.dot_dimension_numbers<[1], [0], [0], [1], [0, 0, 1, 1], [], []>} : vector<8x8xf32>, vector<8x8xf32>, vector<8x8xf32> -> vector<8x8xf32>
    %40 = vector.broadcast %12 : f32 to vector<8x8xf32>
    %41 = arith.select %11, %39, %40 : vector<8x8xi1>, vector<8x8xf32>
    %cst_20 = arith.constant dense<0xFF800000> : vector<8xf32>
    %42 = vector.multi_reduction <maximumf>, %41, %cst_20 [1] : vector<8x8xf32> to vector<8xf32>
    %43 = vector.shape_cast %42 : vector<8xf32> to vector<8x1xf32>
    %44 = vector.broadcast %43 : vector<8x1xf32> to vector<8x8xf32>
    %45 = arith.subf %41, %44 : vector<8x8xf32>
    %46 = math.exp %45 : vector<8x8xf32>
    %cst_21 = arith.constant dense<0.000000e+00> : vector<8xf32>
    %47 = vector.multi_reduction <add>, %46, %cst_21 [1] : vector<8x8xf32> to vector<8xf32>
    %48 = vector.shape_cast %47 : vector<8xf32> to vector<8x1xf32>
    %49 = tpu.reciprocal %48 {approx = true} : vector<8x1xf32> -> vector<8x1xf32>
    %50 = arith.mulf %48, %49 : vector<8x1xf32>
    %cst_22 = arith.constant 2.000000e+00 : f32
    %51 = vector.broadcast %cst_22 : f32 to vector<8x1xf32>
    %52 = arith.subf %51, %50 : vector<8x1xf32>
    %53 = arith.mulf %49, %52 : vector<8x1xf32>
    %cst_23 = arith.constant dense<0.000000e+00> : vector<8x8xf32>
    %54 = tpu.matmul %46, %37, %cst_23 {dimension_numbers = #tpu.dot_dimension_numbers<[1], [0], [0], [1], [0, 0, 1, 1], [], []>} : vector<8x8xf32>, vector<8x8xf32>, vector<8x8xf32> -> vector<8x8xf32>
    %55 = vector.broadcast %53 : vector<8x1xf32> to vector<8x8xf32>
    %56 = arith.mulf %54, %55 : vector<8x8xf32>
    %57 = vector.extract_strided_slice %3 {offsets = [0, 16], sizes = [8, 8], strides = [1, 1]} : vector<8x32xf32> to vector<8x8xf32>
    %58 = vector.extract_strided_slice %5 {offsets = [0, 16], sizes = [8, 8], strides = [1, 1]} : vector<8x32xf32> to vector<8x8xf32>
    %59 = vector.extract_strided_slice %7 {offsets = [0, 16], sizes = [8, 8], strides = [1, 1]} : vector<8x32xf32> to vector<8x8xf32>
    %60 = tpu.transpose %58, [1, 0] : vector<8x8xf32> -> vector<8x8xf32>
    %cst_24 = arith.constant dense<0.000000e+00> : vector<8x8xf32>
    %61 = tpu.matmul %57, %60, %cst_24 {dimension_numbers = #tpu.dot_dimension_numbers<[1], [0], [0], [1], [0, 0, 1, 1], [], []>} : vector<8x8xf32>, vector<8x8xf32>, vector<8x8xf32> -> vector<8x8xf32>
    %62 = vector.broadcast %12 : f32 to vector<8x8xf32>
    %63 = arith.select %11, %61, %62 : vector<8x8xi1>, vector<8x8xf32>
    %cst_25 = arith.constant dense<0xFF800000> : vector<8xf32>
    %64 = vector.multi_reduction <maximumf>, %63, %cst_25 [1] : vector<8x8xf32> to vector<8xf32>
    %65 = vector.shape_cast %64 : vector<8xf32> to vector<8x1xf32>
    %66 = vector.broadcast %65 : vector<8x1xf32> to vector<8x8xf32>
    %67 = arith.subf %63, %66 : vector<8x8xf32>
    %68 = math.exp %67 : vector<8x8xf32>
    %cst_26 = arith.constant dense<0.000000e+00> : vector<8xf32>
    %69 = vector.multi_reduction <add>, %68, %cst_26 [1] : vector<8x8xf32> to vector<8xf32>
    %70 = vector.shape_cast %69 : vector<8xf32> to vector<8x1xf32>
    %71 = tpu.reciprocal %70 {approx = true} : vector<8x1xf32> -> vector<8x1xf32>
    %72 = arith.mulf %70, %71 : vector<8x1xf32>
    %cst_27 = arith.constant 2.000000e+00 : f32
    %73 = vector.broadcast %cst_27 : f32 to vector<8x1xf32>
    %74 = arith.subf %73, %72 : vector<8x1xf32>
    %75 = arith.mulf %71, %74 : vector<8x1xf32>
    %cst_28 = arith.constant dense<0.000000e+00> : vector<8x8xf32>
    %76 = tpu.matmul %68, %59, %cst_28 {dimension_numbers = #tpu.dot_dimension_numbers<[1], [0], [0], [1], [0, 0, 1, 1], [], []>} : vector<8x8xf32>, vector<8x8xf32>, vector<8x8xf32> -> vector<8x8xf32>
    %77 = vector.broadcast %75 : vector<8x1xf32> to vector<8x8xf32>
    %78 = arith.mulf %76, %77 : vector<8x8xf32>
    %79 = vector.extract_strided_slice %3 {offsets = [0, 24], sizes = [8, 8], strides = [1, 1]} : vector<8x32xf32> to vector<8x8xf32>
    %80 = vector.extract_strided_slice %5 {offsets = [0, 24], sizes = [8, 8], strides = [1, 1]} : vector<8x32xf32> to vector<8x8xf32>
    %81 = vector.extract_strided_slice %7 {offsets = [0, 24], sizes = [8, 8], strides = [1, 1]} : vector<8x32xf32> to vector<8x8xf32>
    %82 = tpu.transpose %80, [1, 0] : vector<8x8xf32> -> vector<8x8xf32>
    %cst_29 = arith.constant dense<0.000000e+00> : vector<8x8xf32>
    %83 = tpu.matmul %79, %82, %cst_29 {dimension_numbers = #tpu.dot_dimension_numbers<[1], [0], [0], [1], [0, 0, 1, 1], [], []>} : vector<8x8xf32>, vector<8x8xf32>, vector<8x8xf32> -> vector<8x8xf32>
    %84 = vector.broadcast %12 : f32 to vector<8x8xf32>
    %85 = arith.select %11, %83, %84 : vector<8x8xi1>, vector<8x8xf32>
    %cst_30 = arith.constant dense<0xFF800000> : vector<8xf32>
    %86 = vector.multi_reduction <maximumf>, %85, %cst_30 [1] : vector<8x8xf32> to vector<8xf32>
    %87 = vector.shape_cast %86 : vector<8xf32> to vector<8x1xf32>
    %88 = vector.broadcast %87 : vector<8x1xf32> to vector<8x8xf32>
    %89 = arith.subf %85, %88 : vector<8x8xf32>
    %90 = math.exp %89 : vector<8x8xf32>
    %cst_31 = arith.constant dense<0.000000e+00> : vector<8xf32>
    %91 = vector.multi_reduction <add>, %90, %cst_31 [1] : vector<8x8xf32> to vector<8xf32>
    %92 = vector.shape_cast %91 : vector<8xf32> to vector<8x1xf32>
    %93 = tpu.reciprocal %92 {approx = true} : vector<8x1xf32> -> vector<8x1xf32>
    %94 = arith.mulf %92, %93 : vector<8x1xf32>
    %cst_32 = arith.constant 2.000000e+00 : f32
    %95 = vector.broadcast %cst_32 : f32 to vector<8x1xf32>
    %96 = arith.subf %95, %94 : vector<8x1xf32>
    %97 = arith.mulf %93, %96 : vector<8x1xf32>
    %cst_33 = arith.constant dense<0.000000e+00> : vector<8x8xf32>
    %98 = tpu.matmul %90, %81, %cst_33 {dimension_numbers = #tpu.dot_dimension_numbers<[1], [0], [0], [1], [0, 0, 1, 1], [], []>} : vector<8x8xf32>, vector<8x8xf32>, vector<8x8xf32> -> vector<8x8xf32>
    %99 = vector.broadcast %97 : vector<8x1xf32> to vector<8x8xf32>
    %100 = arith.mulf %98, %99 : vector<8x8xf32>
    %101 = tpu.concatenate %34, %56, %78, %100 in 1 : vector<8x8xf32>, vector<8x8xf32>, vector<8x8xf32>, vector<8x8xf32> -> vector<8x32xf32>
    %c0_34 = arith.constant 0 : index
    %c0_35 = arith.constant 0 : index
    %102 = vector.load %arg6[%c0_34, %c0_35] : memref<32x32xf32, #tpu.memory_space<vmem>>, vector<32x32xf32>
    %cst_36 = arith.constant dense<0.000000e+00> : vector<8x32xf32>
    %103 = tpu.matmul %101, %102, %cst_36 {dimension_numbers = #tpu.dot_dimension_numbers<[1], [1], [0], [0], [0, 0, 1, 0], [], []>} : vector<8x32xf32>, vector<32x32xf32>, vector<8x32xf32> -> vector<8x32xf32>
    %c0_37 = arith.constant 0 : index
    %c0_38 = arith.constant 0 : index
    %104 = vector.load %arg7[%c0_37, %c0_38] : memref<1x32xf32, #tpu.memory_space<vmem>>, vector<1x32xf32>
    %105 = vector.broadcast %104 : vector<1x32xf32> to vector<8x32xf32>
    %106 = arith.addf %103, %105 : vector<8x32xf32>
    %c0_39 = arith.constant 0 : index
    %c0_40 = arith.constant 0 : index
    %c0_41 = arith.constant 0 : index
    %107 = vector.load %arg8[%c0_39, %c0_40, %c0_41] : memref<1x8x32xf32, #tpu.memory_space<vmem>>, vector<1x8x32xf32>
    %108 = vector.shape_cast %107 : vector<1x8x32xf32> to vector<8x32xf32>
    %109 = vector.shape_cast %106 : vector<8x32xf32> to vector<1x8x32xf32>
    tpu.vector_store %arg8[%c0_39, %c0_40, %c0_41], %109 {strides = array<i32>} : memref<1x8x32xf32, #tpu.memory_space<vmem>>, vector<1x8x32xf32>,
    return
  }
  func.func @transform_0(%arg0: i32, %arg1: i32) -> (i32, i32, i32) {
    %c0_i32 = arith.constant 0 : i32
    %c0_i32_0 = arith.constant 0 : i32
    return %arg0, %arg1, %c0_i32 : i32, i32, i32
  }
  func.func @transform_1(%arg0: i32, %arg1: i32) -> (i32, i32, i32) {
    %c0_i32 = arith.constant 0 : i32
    %c0_i32_0 = arith.constant 0 : i32
    %c0_i32_1 = arith.constant 0 : i32
    return %arg0, %c0_i32, %c0_i32_0 : i32, i32, i32
  }
  func.func @transform_2(%arg0: i32, %arg1: i32) -> (i32, i32, i32) {
    %c0_i32 = arith.constant 0 : i32
    %c0_i32_0 = arith.constant 0 : i32
    %c0_i32_1 = arith.constant 0 : i32
    return %arg0, %c0_i32, %c0_i32_0 : i32, i32, i32
  }
  func.func @transform_3(%arg0: i32, %arg1: i32) -> (i32, i32, i32, i32) {
    %c0_i32 = arith.constant 0 : i32
    %c0_i32_0 = arith.constant 0 : i32
    %c0_i32_1 = arith.constant 0 : i32
    return %arg0, %c0_i32, %arg1, %c0_i32_0 : i32, i32, i32, i32
  }
  func.func @transform_4(%arg0: i32, %arg1: i32) -> (i32, i32) {
    %c0_i32 = arith.constant 0 : i32
    %c0_i32_0 = arith.constant 0 : i32
    %c0_i32_1 = arith.constant 0 : i32
    return %c0_i32, %c0_i32_0 : i32, i32
  }
  func.func @transform_5(%arg0: i32, %arg1: i32) -> (i32, i32) {
    %c0_i32 = arith.constant 0 : i32
    %c0_i32_0 = arith.constant 0 : i32
    %c0_i32_1 = arith.constant 0 : i32
    return %c0_i32, %c0_i32_0 : i32, i32
  }
  func.func @transform_6(%arg0: i32, %arg1: i32) -> (i32, i32, i32) {
    %c0_i32 = arith.constant 0 : i32
    %c0_i32_0 = arith.constant 0 : i32
    return %arg0, %arg1, %c0_i32 : i32, i32, i32
  }
}

</mosaic_0001>

<bundles_post_ra>
// kernel: tpu_custom_call.1
= control target key start
LH: loop header
LB: loop body
LE: loop exit
PB: predicated region body
PF: predicated region fallthrough
CT: control target
= control target key end

     0   :  { %s1611_s0 = inlined_call_operand.hbm [shape: f32[2,8,32], index: 0, kind: input, shape index: {}]   ;;  %s1612_s1 = inlined_call_operand.hbm [shape: f32[2,8,32], index: 1, kind: input, shape index: {}]   ;;  %s1613_s2 = inlined_call_operand.hbm [shape: f32[2,8,32], index: 2, kind: input, shape index: {}]   ;;  %s1614_s3 = inlined_call_operand.hbm [shape: s32[2,1,8,8], index: 3, kind: input, shape index: {}]   ;;  %s1615_s4 = inlined_call_operand.hbm [shape: f32[32,32], index: 4, kind: input, shape index: {}]   ;;  %s1616_s5 = inlined_call_operand.vmem [shape: f32[1,32], index: 5, kind: input, shape index: {}]   ;;  %s1617_s6 = inlined_call_operand.hbm [shape: f32[2,8,32], index: 6, kind: output, shape index: {}]  }
   0x1   :  { %1623 = sst [smem:[#allocation22_spill]] %s1611_s0 }
   0x2   :  { %1624 = sst [smem:[#allocation23_spill]] %s1612_s1 }
   0x3   :  { %1625 = sst [smem:[#allocation24_spill]] %s1615_s4 }
   0x4   :  { %11 = vsyncpa [#allocation3], 0 }
   0x5   :  { %13 = vsyncpa [#allocation3 + $0x1], 0 }
   0x6   :  { %14 = vsyncpa [#allocation6], 0 }
   0x7   :  { %16 = vsyncpa [#allocation6 + $0x1], 0 }
   0x8   :  { %17 = vsyncpa [#allocation9], 0 }
   0x9   :  { %19 = vsyncpa [#allocation9 + $0x1], 0 }
   0xa   :  { %20 = vsyncpa [#allocation4], 0 }
   0xb   :  { %22 = vsyncpa [#allocation4 + $0x1], 0  ;;  %s1377_s21 = smov 0   ;;  %s1379_s22 = smov 0  }
   0xc   :  { %s1381_s23 = smov 0   ;;  %s1383_s24 = smov 0  }
   0xd   :  { %s1385_s25 = smov 0   ;;  %s1387_s26 = smov 0  }
   0xe LB: > { %1626 = sst [smem:[#allocation17_spill]] %s1319_s23  ;;  %s1408_s27 = sadd.s32 4294967295, %s1331_s26   ;;  %s1331_s26 = sphi %s1387_s26, %s28_s26   ;;  %s1327_s25 = sphi %s1385_s25, %s1644_s25   ;;  %s1323_s24 = sphi %s1383_s24, %s1643_s24   ;;  %s1319_s23 = sphi %s1381_s23, %s1642_s23   ;;  %s1315_s22 = sphi %s1379_s22, %s1646_s22   ;;  %s1311_s21 = sphi %s1377_s21, %s1645_s21  }
   0xf   : > { %1627 = sst [smem:[#allocation18_spill]] %s1327_s25  ;;  %s934_s28 = sadd.s32 4294967294, %s1331_s26  }
  0x10   : > { %p62_p0 = scmp.ne.s32.totalorder %s1315_s22, %s1311_s21  ;;  %p63_p1 = scmp.eq.s32.totalorder %s1408_s27, 0 }
  0x11   : > { %p210_p2 = scmp.eq.s32.totalorder %s1408_s27, 1  ;;  %p216_p3 = scmp.eq.s32.totalorder %s934_s28, 1 }
  0x12   : > { %p1417_p4 = por %p63_p1, %p62_p0  ;;  %p935_p5 = scmp.ge.s32.totalorder %s1331_s26, 1 }
  0x13   : > { %p1422_p6 = por %p216_p3, %p62_p0  ;;  %p223_p7 = scmp.lt.s32.totalorder %s1331_s26, 3 }
  0x14   : > { %s1631_s4 = sld [smem:[#allocation24_spill]]  ;;  %s1333_s11 = smov [#allocation10]  }
  0x15   : > { %s1629_s30 = scalar_select %p1422_p6, 1, 0 }
  0x16   : > { %p1430_p8 = pnand %p935_p5, %p223_p7  ;;  %s236_s12 = sshll.u32 %s1333_s11, 4  ;;  %s237_s12 = int_to_ptr.vmem [resolvable:$true] %s236_s12 }
  0x17   : > { %1630 = sst [smem:[#allocation19_spill]] %s1629_s30  ;;  %p937_p11 = scmp.ge.s32.totalorder %s1331_s26, 2 }
  0x18   : > { %p988_p9 = pneg %p1430_p8  ;;  %s1334_s13 = smov 128  }
  0x19   : > { %s1335_s14 = smov 8   ;;  %s40_s15 = sadd.s32 1, %s1327_s25 }
  0x1a   : > { %s234_s9 = sshll.u32 %s1631_s4, 4  ;;  %p989_p10 = pnand %p988_p9, %p63_p1  ;;  %s235_s9 = int_to_ptr.hbm [resolvable:$true] %s234_s9 }
  0x1b   : > { %p42_p12 = scmp.ge.s32.totalorder %s40_s15, 2  ;;  %s49_s16 = sadd.s32 1, %s1319_s23 }
  0x1c   : > { %991 = dma.hbm_to_vmem [thread:$0]  (!%p989_p10), %s235_s9, 512, %s237_s12, [#allocation9], %s1334_s13, %s1334_s13, %s1335_s14  }
  0x1d   : > { %p56_p13 = scmp.ne.s32.totalorder %s1319_s23, %s1315_s22  ;;  %p57_p0 = scmp.eq.s32.totalorder %s1331_s26, 0 }
  0x1e   : > { %s1648_s15 = smov (%p42_p12, %s40_s15), 0  ;;  %p1010_p7 = scmp.lt.s32.totalorder %s1331_s26, 2 }
  0x1f   : > { %1633 = sst [smem:[#allocation20_spill]] %s1648_s15  ;;  %p58_p3 = por %p57_p0, %p56_p13 }
  0x20   : > { %p1448_p5 = por %p210_p2, %p56_p13  ;;  %s44_s18 = ssub.s32 %s1327_s25, %s1648_s15 }
  0x21   : > { %p47_p9 = scmp.eq.s32.totalorder %s44_s18, 0  ;;  %s253_s19 = sand.u32 1, %s1319_s23  }
  0x22   : > { %s1456_s20 = sshll.u32 %s253_s19, 3  ;;  %s939_s28 = sshll.u32 %s1327_s25, 3 }
  0x23   : > { %s1460_s7 = scalar_select %p47_p9, %s1319_s23, %s49_s16  }
  0x24   : > { %p1462_p10 = pnand %p1010_p7, %p58_p3  ;;  %s1621_s9 = sand.u32 1, %s1331_s26  }
  0x25   : > { %1635 = sst [smem:[#allocation21_spill]] %s1460_s7  ;;  %s277_s18 = scalar_lea.vmem [#allocation5], %s1456_s20 }
  0x26   : > { %s1637_s1 = sld [smem:[#allocation23_spill]]  ;;  %s285_s4 = sshll.u32 %s277_s18, 4  ;;  %s286_s4 = int_to_ptr.vmem [resolvable:$true] %s285_s4 }
  0x27   : > { %s274_s16 = scalar_lea.sflag [#allocation6], %s1621_s9  ;;  %s1638_s0 = sld [smem:[#allocation22_spill]] }
  0x28   : > { %s257_s11 = scalar_lea.vmem [#allocation2], %s1456_s20 }
  0x29   : > { %s266_s12 = sshll.u32 %s257_s11, 4  ;;  %s267_s12 = int_to_ptr.vmem [resolvable:$true] %s266_s12 }
  0x2c   : > { %s281_s13 = scalar_lea.hbm %s1637_s1, %s939_s28  ;;  %s300_s1 = scalar_lea.hbm %s1613_s2, %s939_s28 }
  0x2d   : > { %s283_s14 = sshll.u32 %s281_s13, 4  ;;  %s262_s7 = scalar_lea.hbm %s1638_s0, %s939_s28  ;;  %s284_s14 = int_to_ptr.hbm [resolvable:$true] %s283_s14 }
  0x2e   : > { %998 = dma.hbm_to_vmem [thread:$0]  (!%p1462_p10), %s284_s14, 128, %s286_s4, %s274_s16  }
  0x2f   : > { %s264_s23 = sshll.u32 %s262_s7, 4  ;;  %s254_s13 = scalar_lea.sflag [#allocation3], %s253_s19  ;;  %s265_s23 = int_to_ptr.hbm [resolvable:$true] %s264_s23 }
  0x30   : > { %995 = dma.hbm_to_vmem [thread:$0]  (!%p1462_p10), %s265_s23, 128, %s267_s12, %s254_s13  }
  0x31   : > { %s302_s4 = sshll.u32 %s300_s1, 4  ;;  %s296_s14 = scalar_lea.vmem [#allocation7], %s1456_s20  ;;  %s303_s4 = int_to_ptr.hbm [resolvable:$true] %s302_s4 }
  0x32   : > { %s304_s30 = sshll.u32 %s296_s14, 4  ;;  %s320_s7 = scalar_lea.hbm %s1614_s3, %s939_s28  ;;  %s305_s30 = int_to_ptr.vmem [resolvable:$true] %s304_s30 }
  0x33   : > { %1001 = dma.hbm_to_vmem [thread:$0]  (!%p1462_p10), %s303_s4, 128, %s305_s30, %s274_s16  }
  0x34   : > { %s322_s11 = sshll.u32 %s320_s7, 4  ;;  %s315_s19 = scalar_lea.vmem [#allocation8], %s1456_s20  ;;  %s323_s11 = int_to_ptr.hbm [resolvable:$true] %s322_s11 }
  0x35   : > { %s324_s0 = sshll.u32 %s315_s19, 4  ;;  %s1639_s23 = sand.u32 1, %s1331_s26   ;;  %s325_s0 = int_to_ptr.vmem [resolvable:$true] %s324_s0 }
  0x36   : > { %s312_s12 = scalar_lea.sflag [#allocation9], %s1639_s23  ;;  %333 = sbr.rel (%p1430_p8) target bundleno = 1118 (0x45e), region = 44 }
  0x37   : > { %1004 = dma.hbm_to_vmem [thread:$0]  (!%p1462_p10), %s323_s11, 128, %s325_s0, %s312_s12  }
  0x38   : > { %s1498_s1 = sand.u32 (!%p1430_p8), 1, %s1315_s22  }
  0x39   : > { %s1501_s30 = sshll.u32 (!%p1430_p8), %s1498_s1, 3  ;;  %s336_s20 = scalar_lea.sflag (!%p1430_p8), [#allocation3], %s1498_s1 }
  0x3a   : > { %s339_s28 = scalar_lea.vmem (!%p1430_p8), [#allocation2], %s1501_s30 }
  0x3b   : > { %1290 = dma.done.wait (%p1417_p4), %s336_s20, 128  }
  0x3c   : > { %1292 = vsyncadd (%p1417_p4), %s336_s20, 4294967168  ;;  %s345_s0 = sand.u32 1, %s1408_s27   ;;  %s349_s8 = scalar_lea.vmem [#allocation5], %s1501_s30 }
  0x3d   : > { %s346_s10 = scalar_lea.sflag [#allocation6], %s345_s0 }
  0x3e   : > { %1294 = dma.done.wait (%p1417_p4), %s346_s10, 256  }
  0x3f   : > { %1296 = vsyncadd (%p1417_p4), %s346_s10, 4294967040  ;;  %s359_s9 = scalar_lea.vmem [#allocation7], %s1501_s30  ;;  %s366_s16 = scalar_lea.sflag [#allocation9], %s345_s0 }
  0x40   : > { %s369_s13 = scalar_lea.vmem [#allocation8], %s1501_s30 }
  0x41   : > { %1298 = dma.done.wait (%p1417_p4), %s366_s16, 128  }
  0x42   : > { %1300 = vsyncadd (%p1417_p4), %s366_s16, 4294967168 }
  0x43   : > { %1302 = dma.done.wait (%p63_p1), [#allocation9], 512  }
  0x44   : > { %1304 = vsyncadd (%p63_p1), [#allocation9], 4294966784  ;;  %v421_v0 = vld [vmem:[%s349_s8] sm:$0xff]  ;;  %s1336_s18 = smov 120   ;;  %s1337_s4 = smov 112   ;;  %v419_v1 = vld [vmem:[%s339_s28] sm:$0xff] }
  0x45   : > { %492 = vrot.lane.b32.xlu0 %v421_v0, %s1336_s18  ;;  %562 = vrot.lane.b32.xlu2 %v421_v0, %s1337_s4  ;;  %v420_v2 = vmul.f32 0.17677669, %v419_v1  ;;  %s1338_s29 = smov 104   ;;  %vm425_vm0 = vcmask 64512   ;;  %v422_v9 = vld [vmem:[%s359_s9] sm:$0xff]  ;;  %v423_v10 = vld [vmem:[%s369_s13] sm:$0xff] }
  0x46   : > { %953 = vmatpush.xpose.msk.msra.mxu0 %vm425_vm0, %v421_v0  ;;  %484 = vmatpush.msra.mxu1 %v422_v9  ;;  %vm424_vm1 = vcmp.ne.s32.totalorder %v423_v10, 0  ;;  %s1339_s27 = smov 8   ;;  %s1340_s14 = smov 24   ;;  %v718_v60 = vld [vmem:[#allocation10 + $0x18] sm:$0xff]  ;;  %vm723_vm2 = vcmask 261120   ;;  %v717_v61 = vld [vmem:[#allocation10 + $0x10] sm:$0xff] }
  0x47   : > { %v716_v62 = vld [vmem:[#allocation10 + $0x8] sm:$0xff]  ;;  %s1341_s25 = smov 16   ;;  %vm711_vm3 = vcmask 130048   ;;  %vm713_vm4 = vcmask 195584   ;;  %s971_s15 = sshll.u32 %s1323_s24, 3 }
  0x48   : > { %965 = vmatpush.xpose.msk.msrb.mxu1 %vm723_vm2, %v718_v60  ;;  %s772_s19 = scalar_lea.hbm %s1617_s6, %s971_s15  ;;  %s418_s20 = scalar_lea.vmem [#allocation11], %s1501_s30 }
  0x49   : > { %954 = vmatmul.msk.f32.vlgmr.msra.gmra.mxu0 %vm425_vm0, %v420_v2  ;;  %s774_s28 = sshll.u32 %s418_s20, 4  ;;  %s776_s0 = sshll.u32 %s772_s19, 4  ;;  %s775_s28 = int_to_ptr.vmem [resolvable:$true] %s774_s28  ;;  %s777_s0 = int_to_ptr.hbm [resolvable:$true] %s776_s0 }
  0x4a   : > { %s761_s10 = scalar_lea.sflag [#allocation4], %s1498_s1  ;;  %s1251_s24 = sshra.s32 %s777_s0, 4  ;;  %s1252_s24 = int_to_ptr.hbm [resolvable:$true] %s1251_s24 }
  0x4b   : > { %s1253_s8 = scalar_lea.hbm %s1252_s24, 8  ;;  %s1257_s30 = scalar_lea.hbm %s1617_s6, 16 }
  0x4c   : > { %966 = vmatpush.xpose.msk.msrb.mxu1 %vm723_vm2, %v717_v61  ;;  %p1254_p1 = scmp.ne.s32.totalorder %s1252_s24, %s1253_s8  ;;  %p1258_p8 = scmp.lt.s32.totalorder %s1252_s24, %s1617_s6 }
  0x4d   : > { %490 = vrot.lane.b32.xlu0 %v420_v2, %s1336_s18  ;;  %560 = vrot.lane.b32.xlu2 %v420_v2, %s1337_s4  ;;  %p1259_p12 = scmp.lt.s32.totalorder %s1257_s30, %s1253_s8 }
  0x4e   : > { %p1255_p2 = pnand %p1254_p1, %p1448_p5 }
  0x4f   : > { %p1260_p13 = por %p1259_p12, %p1258_p8 }
  0x50   : > { %967 = vmatpush.xpose.msk.msrb.mxu1 %vm723_vm2, %v716_v62  ;;  %p1256_p4 = pneg %p1255_p2 }
  0x52   : > { %p1261_p0 = pnand %p1260_p13, %p1256_p4 }
  0x55   : > { %631 = vrot.lane.b32.xlu0 %v421_v0, %s1338_s29  ;;  %629 = vrot.lane.b32.xlu2 %v420_v2, %s1338_s29  ;;  %v715_v0 = vld [vmem:[#allocation10] sm:$0xff] }
  0x56   : > { %968 = vmatpush.xpose.msk.msrb.mxu1 %vm723_vm2, %v715_v0 }
  0x9f   : > { %v563_v3 = vpop.permute.xlu2 %562 }
  0xa7   : > { %v561_v5 = vpop.permute.xlu2 %560 }
  0xaf   : > { %v630_v8 = vpop.permute.xlu2 %629 }
  0xb7   : > { %v493_v4 = vpop.permute.xlu0 %492 }
  0xb8   : > { %956 = vmatpush.xpose.msk.msra.mxu2 %vm425_vm0, %v493_v4 }
  0xbf   : > { %v491_v6 = vpop.permute.xlu0 %490 }
  0xc0   : > { %957 = vmatmul.msk.f32.vlgmr.msra.gmra.mxu2 %vm425_vm0, %v491_v6 }
  0xc6   : > { %v449_v11 = vpop.f32.mrf.mxu0 }
  0xc7   : > { %v632_v7 = vpop.permute.xlu0 %631  ;;  %v452_v18 = vsel %vm424_vm1, %v449_v11, -1.767767e+19 }
  0xc8   : > { %962 = vmatpush.xpose.msk.msrb.mxu0 %vm425_vm0, %v632_v7  ;;  %v453_v21 = vsel %vm425_vm0, %v452_v18, -inf }
  0xcb   : > { %963 = vmatmul.msk.f32.vlgmr.msrb.gmra.mxu0 %vm425_vm0, %v630_v8 }
 0x143   : > { %v515_v12 = vpop.f32.mrf.mxu2 }
 0x144   : > { %v518_v13 = vsel %vm424_vm1, %v515_v12, -1.767767e+19 }
 0x145   : > { %v519_v14 = vsel %vm425_vm0, %v518_v13, -inf }
 0x146   : > { %520 = vmax.xlane.f32.xlu1 %v519_v14 }
 0x148   : > { %v654_v15 = vpop.f32.mrf.mxu0 }
 0x149   : > { %v657_v16 = vsel %vm424_vm1, %v654_v15, -1.767767e+19 }
 0x14a   : > { %v658_v17 = vsel %vm425_vm0, %v657_v16, -inf }
 0x14b   : > { %659 = vmax.xlane.f32.xlu2 %v658_v17 }
 0x15f   : > { %533 = vrot.lane.b32.xlu1 %v422_v9, %s1336_s18 }
 0x167   : > { %602 = vrot.lane.b32.xlu1 %v422_v9, %s1337_s4 }
 0x16f   : > { %671 = vrot.lane.b32.xlu1 %v422_v9, %s1338_s29 }
 0x199   : > { %454 = vmax.xlane.f32.xlu1 %v453_v21 }
 0x1b9   : > { %v521_v19 = vpop.xlane.xlu1 %520 }
 0x1ba   : > { %v522_v20 = vsub.f32 %v518_v13, %v521_v19 }
 0x1bc   : > { %v523_v22 = vmul.f32 1.442695, %v522_v20  ;;  %v1070_v20 = vld [vmem:[%s1616_s5] ss:$0 sm:$0xff] }
 0x1be   : > { %1071 = vpow2.f32 %v523_v22  ;;  %v660_v23 = vpop.xlane.xlu2 %659 }
 0x1bf   : > { %v661_v24 = vsub.f32 %v657_v16, %v660_v23 }
 0x1c1   : > { %v662_v25 = vmul.f32 1.442695, %v661_v24 }
 0x1c3   : > { %1073 = vpow2.f32 %v662_v25 }
 0x1c4   : > { %v1072_v26 = vpop.eup %1071 }
 0x1c5   : > { %v525_v27 = vsel %vm425_vm0, %v1072_v26, 0.0 }
 0x1c6   : > { %526 = vadd.xlane.f32.xlu2 %v525_v27 }
 0x1c9   : > { %v1074_v28 = vpop.eup %1073 }
 0x1ca   : > { %v664_v29 = vsel %vm425_vm0, %v1074_v28, 0.0 }
 0x1ce   : > { %665 = vadd.xlane.f32.xlu2 %v664_v29 }
 0x1d1   : > { %v534_v30 = vpop.permute.xlu1 %533 }
 0x1d2   : > { %554 = vmatpush.msra.mxu3 %v534_v30 }
 0x1d3   : > { %958 = vmatmul.msk.f32.vlgmr.msra.gmra.mxu3 %vm425_vm0, %v1072_v26 }
 0x1d4   : > { %959 = vmatpush.xpose.msk.msrb.mxu3 %vm425_vm0, %v563_v3 }
 0x1d9   : > { %v603_v31 = vpop.permute.xlu1 %602 }
 0x1da   : > { %623 = vmatpush.msra.mxu3 %v603_v31 }
 0x1db   : > { %960 = vmatmul.msk.f32.vlgmr.msrb.gmra.mxu3 %vm425_vm0, %v561_v5 }
 0x1e1   : > { %v672_v32 = vpop.permute.xlu1 %671 }
 0x1e2   : > { %692 = vmatpush.msrb.mxu2 %v672_v32 }
 0x1e3   : > { %964 = vmatmul.msk.f32.vlgmr.msrb.gmra.mxu2 %vm425_vm0, %v1074_v28 }
 0x20c   : > { %v455_v33 = vpop.xlane.xlu1 %454 }
 0x20d   : > { %v456_v34 = vsub.f32 %v452_v18, %v455_v33 }
 0x20f   : > { %v457_v35 = vmul.f32 1.442695, %v456_v34 }
 0x211   : > { %1075 = vpow2.f32 %v457_v35 }
 0x217   : > { %v1076_v37 = vpop.eup %1075 }
 0x218   : > { %955 = vmatmul.msk.f32.vlgmr.msra.gmra.mxu1 %vm425_vm0, %v1076_v37  ;;  %v459_v59 = vsel %vm425_vm0, %v1076_v37, 0.0 }
 0x239   : > { %v527_v36 = vpop.xlane.xlu2 %526 }
 0x23a   : > { %1077 = vrcp.f32 %v527_v36 }
 0x240   : > { %v1078_v38 = vpop.eup %1077 }
 0x241   : > { %v529_v39 = vmul.f32 %v1078_v38, %v527_v36  ;;  %v666_v47 = vpop.xlane.xlu2 %665 }
 0x242   : > { %1079 = vrcp.f32 %v666_v47 }
 0x243   : > { %v530_v40 = vsub.f32 2.0, %v529_v39 }
 0x245   : > { %v531_v41 = vmul.f32 %v1078_v38, %v530_v40 }
 0x248   : > { %v1080_v48 = vpop.eup %1079 }
 0x249   : > { %v668_v49 = vmul.f32 %v1080_v48, %v666_v47 }
 0x24b   : > { %v669_v50 = vsub.f32 2.0, %v668_v49 }
 0x24d   : > { %v670_v51 = vmul.f32 %v1080_v48, %v669_v50 }
 0x256   : > { %v556_v42 = vpop.f32.mrf.mxu3 }
 0x257   : > { %v559_v43 = vmul.f32 %v556_v42, %v531_v41 }
 0x259   : > { %699 = vrot.lane.b32.xlu2 %v559_v43, %s1339_s27 }
 0x25e   : > { %v585_v44 = vpop.f32.mrf.mxu3 }
 0x25f   : > { %v588_v45 = vsel %vm424_vm1, %v585_v44, -1.767767e+19 }
 0x260   : > { %v589_v46 = vsel %vm425_vm0, %v588_v45, -inf }
 0x261   : > { %590 = vmax.xlane.f32.xlu0 %v589_v46 }
 0x266   : > { %v694_v52 = vpop.f32.mrf.mxu2 }
 0x267   : > { %v697_v53 = vmul.f32 %v694_v52, %v670_v51 }
 0x269   : > { %707 = vrot.lane.b32.xlu1 %v697_v53, %s1340_s14 }
 0x295   : > { %v486_v12 = vpop.f32.mrf.mxu1 }
 0x2b3   : > { %v700_v14 = vpop.permute.xlu2 %699 }
 0x2d4   : > { %v591_v54 = vpop.xlane.xlu0 %590 }
 0x2d5   : > { %v592_v55 = vsub.f32 %v588_v45, %v591_v54 }
 0x2d7   : > { %v593_v56 = vmul.f32 1.442695, %v592_v55 }
 0x2d9   : > { %1081 = vpow2.f32 %v593_v56 }
 0x2db   : > { %v708_v17 = vpop.permute.xlu1 %707 }
 0x2df   : > { %v1082_v57 = vpop.eup %1081 }
 0x2e0   : > { %961 = vmatmul.msk.f32.vlgmr.msra.gmra.mxu3 %vm425_vm0, %v1082_v57  ;;  %v595_v58 = vsel %vm425_vm0, %v1082_v57, 0.0 }
 0x2e1   : > { %596 = vadd.xlane.f32.xlu0 %v595_v58 }
 0x2e9   : > { %460 = vadd.xlane.f32.xlu0 %v459_v59 }
 0x354   : > { %v597_v63 = vpop.xlane.xlu0 %596 }
 0x355   : > { %1083 = vrcp.f32 %v597_v63 }
 0x35b   : > { %v1084_v1 = vpop.eup %1083 }
 0x35c   : > { %v599_v2 = vmul.f32 %v1084_v1, %v597_v63  ;;  %v461_v7 = vpop.xlane.xlu0 %460 }
 0x35d   : > { %1085 = vrcp.f32 %v461_v7 }
 0x35e   : > { %v600_v3 = vsub.f32 2.0, %v599_v2 }
 0x360   : > { %v601_v4 = vmul.f32 %v1084_v1, %v600_v3 }
 0x363   : > { %v625_v5 = vpop.f32.mrf.mxu3  ;;  %v1086_v8 = vpop.eup %1085 }
 0x364   : > { %v628_v6 = vmul.f32 %v625_v5, %v601_v4  ;;  %v463_v9 = vmul.f32 %v1086_v8, %v461_v7 }
 0x366   : > { %703 = vrot.lane.b32.xlu0 %v628_v6, %s1341_s25  ;;  %v464_v10 = vsub.f32 2.0, %v463_v9 }
 0x368   : > { %v465_v11 = vmul.f32 %v1086_v8, %v464_v10 }
 0x36a   : > { %v489_v13 = vmul.f32 %v486_v12, %v465_v11 }
 0x36c   : > { %v710_v15 = vsel %vm425_vm0, %v489_v13, %v700_v14 }
 0x3d8   : > { %v704_v16 = vpop.permute.xlu0 %703 }
 0x3d9   : > { %v712_v18 = vsel %vm711_vm3, %v710_v15, %v704_v16 }
 0x3da   : > { %v714_v19 = vsel %vm713_vm4, %v712_v18, %v708_v17 }
 0x3db   : > { %969 = vmatmul.msk.f32.vlgmr.msrb.gmra.mxu1 %vm723_vm2, %v714_v19 }
 0x458   : > { %v756_v21 = vpop.f32.mrf.mxu1 }
 0x459   : > { %v757_v22 = vadd.f32 %v1070_v20, %v756_v21 }
 0x45b   : > { %759 = vst.msk [vmem:[%s418_s20] sm:$0xff] %vm723_vm2, %v757_v22 }
 0x45c   : > { %1264 = shalt.err (!%p1261_p0)
}
 0x45d   : > { %986 = dma.vmem_to_hbm [thread:$0]  (%p1448_p5), %s775_s28, 128, %s777_s0, %s761_s10  }
 0x45e PF: > { %s788_s4 = sand.u32 1, %s1311_s21   ;;  %p1006_p3 = pnand %p937_p11, %p1422_p6 }
 0x45f   : > { %s789_s29 = scalar_lea.sflag [#allocation4], %s788_s4 }
 0x460   : > { %p1007_p7 = pneg %p1006_p3 }
 0x462   : > { %1306 = dma.done.wait (%p1007_p7), %s789_s29, 128  }
 0x463   : > { %1308 = vsyncadd (%p1007_p7), %s789_s29, 4294967168  ;;  %s28_s26 = sadd.s32 1, %s1331_s26   ;;  %s1641_s27 = sld [smem:[#allocation17_spill]] }
 0x464   : > { %p25_p9 = scmp.ge.s32.totalorder %s28_s26, 4   ;;  %s1642_s23 = sld [smem:[#allocation21_spill]] }
 0x465   : > { %s1643_s24 = sld [smem:[#allocation18_spill]]  ;;  %s1645_s21 = smov %s1315_s22 }
 0x466   : > { %s1644_s25 = sld [smem:[#allocation20_spill]]  ;;  %27 = sbr.rel (!%p25_p9) target bundleno = 14 (0xe), region = 130 }
 0x469   : > { %s1646_s22 = smov %s1641_s27 }
 0x46b   :  { %795 = vsyncpa [#allocation3], 1 }
 0x46c   :  { %797 = vsyncpa [#allocation3 + $0x1], 1 }
 0x46d   :  { %798 = vsyncpa [#allocation6], 1 }
 0x46e   :  { %800 = vsyncpa [#allocation6 + $0x1], 1 }
 0x46f   :  { %801 = vsyncpa [#allocation9], 1 }
 0x470   :  { %803 = vsyncpa [#allocation9 + $0x1], 1 }
 0x471   :  { %804 = vsyncpa [#allocation4], 1 }
 0x472   :  { %806 = vsyncpa [#allocation4 + $0x1], 1 }

</bundles_post_ra>
